<compile_context>
chip_gen: v7x
topology: tpu7x:2x2x1
jax: 0.10.0
libtpu: 0.0.40
codegen_flags: <defaults>
</compile_context>

<pallas_src>
import functools

import jax
import jax.numpy as jnp
from jax.experimental import pallas as pl
from jax.experimental.pallas import tpu as pltpu

BOS_ID = 0   # <s>
PAD_ID = 1   # <pad>
EOS_ID = 2   # </s>


def _round_up(x, m):
    return (x + m - 1) // m * m


def _encode_kernel(max_len, tokens_ref, lengths_ref, ids_ref, mask_ref):
    """One (TB, Lp) row-tile of the encode_plus numeric path.

    tokens_ref : [TB, Lp] int32  raw token ids (row valid up to lengths[row])
    lengths_ref: [TB, 1 ] int32  number of raw tokens per turn
    ids_ref    : [TB, Lp] int32  output input_ids
    mask_ref   : [TB, Lp] int8   output attention_mask
    """
    tokens = tokens_ref[...]                          # (TB, Lp)
    lengths = lengths_ref[...]                        # (TB, 1)
    tb, lp = tokens.shape

    pos = jax.lax.broadcasted_iota(jnp.int32, (tb, lp), 1)

    # Truncate content so that BOS + content + EOS fits in max_len.
    eff = jnp.clip(lengths, 0, max_len - 2)           # (TB, 1)

    # Shift tokens right by one lane on the XLU (token i -> lane i+1); the
    # wrapped lane-0 value is overwritten by the BOS select below.
    shifted = pltpu.roll(tokens, shift=1, axis=1)

    keep = pos <= eff                                  # BOS + content region
    eos = pos == eff + 1                               # single EOS lane
    ids = jnp.where(pos == 0, jnp.int32(BOS_ID),
          jnp.where(keep, shifted,
          jnp.where(eos, jnp.int32(EOS_ID), jnp.int32(PAD_ID))))

    ids_ref[...] = ids
    mask_ref[...] = (keep | eos).astype(mask_ref.dtype)


def _pick_row_tile(B, Lp, tb):
    """Row tile: multiple of 32 (int8 native sublane tile), <= B, VMEM-safe,
    and yielding >= 2 grid steps when B allows (megacore)."""
    if B <= 32:
        return B                                   # full-dim block is allowed
    TB = max(32, (min(tb, B) // 32) * 32)
    # Keep the double-buffered working set (tokens in + ids/mask out) modest.
    tb_cap = max(32, ((32 * 1024 * 1024) // (2 * Lp * 9)) // 32 * 32)
    TB = min(TB, tb_cap)
    if pl.cdiv(B, TB) < 2:                         # single step wastes a core
        TB = min(TB, _round_up(pl.cdiv(B, 2), 32))
    return TB


def features_finetune_forward(tokens, lengths, *, tb=512):
    """tokens: [B, L] int32, lengths: [B] int32 ->
    (input_ids [B, L] int32, attention_mask [B, L] int8)."""
    tokens = jnp.asarray(tokens, jnp.int32)
    lengths = jnp.asarray(lengths, jnp.int32)
    B, L = tokens.shape
    assert L >= 2, "max_length must be >= 2 (BOS + EOS)"

    # Lane-dense output: pad the max_length axis only when it is not already a
    # multiple of 128 (the common 128/256/512 case pays zero pad/slice cost).
    Lp = max(_round_up(L, 128), 128)
    if Lp != L:
        tokens = jnp.pad(tokens, ((0, 0), (0, Lp - L)))

    TB = _pick_row_tile(B, Lp, tb)
    grid = (pl.cdiv(B, TB),)   # partial last block is masked by Pallas

    # vmem limit from the actual double-buffered working set (+slack), capped
    # at 48 MiB so it also fits v7x's 64 MiB physical VMEM with headroom.
    ws = 2 * TB * Lp * 9 + 2 * TB * 4
    vmem_limit = int(min(max(2 * ws, 8 << 20), 48 << 20))

    ids, mask = pl.pallas_call(
        functools.partial(_encode_kernel, L),
        out_shape=(
            jax.ShapeDtypeStruct((B, Lp), jnp.int32),   # input_ids
            jax.ShapeDtypeStruct((B, Lp), jnp.int8),    # attention_mask
        ),
        grid=grid,
        in_specs=[
            pl.BlockSpec((TB, Lp), lambda i: (i, 0)),
            pl.BlockSpec((TB, 1), lambda i: (i, 0)),
        ],
        out_specs=(
            pl.BlockSpec((TB, Lp), lambda i: (i, 0)),
            pl.BlockSpec((TB, Lp), lambda i: (i, 0)),
        ),
        compiler_params=pltpu.CompilerParams(
            dimension_semantics=("parallel",),
            vmem_limit_bytes=vmem_limit,
        ),
    )(tokens, lengths.reshape(B, 1))

    if Lp != L:
        ids, mask = ids[:, :L], mask[:, :L]
    return ids, mask


def _reference(tokens, lengths, L):
    """Pure-JAX reference of the encode_plus numeric semantics."""
    pos = jnp.arange(L, dtype=jnp.int32)[None, :]
    eff = jnp.clip(lengths, 0, L - 2)[:, None]
    shifted = jnp.pad(tokens, ((0, 0), (1, 0)))[:, :L]
    ref_ids = jnp.where(pos == 0, BOS_ID,
              jnp.where(pos <= eff, shifted,
              jnp.where(pos == eff + 1, EOS_ID, PAD_ID))).astype(jnp.int32)
    ref_mask = (pos <= eff + 1).astype(jnp.int8)
    return ref_ids, ref_mask


if __name__ == "__main__":
    # TODO(synk): RobertaTokenizer's string -> subword-id vocabulary lookup has
    # no Pallas equivalent; inputs here are pre-tokenized integer ids.
    key = jax.random.PRNGKey(0)

    # Case 1: aligned shapes (no pad, no slice, 2 parallel grid steps).
    # Case 2: B % TB != 0 and L % 128 != 0 (partial block + column pad/slice).
    for (B, L, tb) in [(96, 128, 512), (37, 100, 32)]:
        key, k_tok, k_len = jax.random.split(key, 3)
        # Raw token ids in the RoBERTa vocab range (avoid special ids 0/1/2).
        tokens = jax.random.randint(k_tok, (B, L), 3, 50265, dtype=jnp.int32)
        # Per-turn raw lengths; some exceed L-2 to exercise truncation.
        lengths = jax.random.randint(k_len, (B,), 1, L + 16, dtype=jnp.int32)

        ids, mask = features_finetune_forward(tokens, lengths, tb=tb)
        jax.block_until_ready((ids, mask))

        ref_ids, ref_mask = _reference(tokens, lengths, L)
        assert ids.shape == (B, L) and ids.dtype == jnp.int32
        assert mask.shape == (B, L) and mask.dtype == jnp.int8
        assert bool(jnp.all(ids == ref_ids)), f"input_ids mismatch for {(B, L)}"
        assert bool(jnp.all(mask == ref_mask)), f"attention_mask mismatch for {(B, L)}"

    print("KERNEL_OK")
</pallas_src>

<mosaic_0001>
module attributes {stable_mosaic.version = 11 : i64} {
  func.func @_encode_kernel(%arg0: i32, %arg1: memref<64x128xi32, #tpu.memory_space<vmem>>, %arg2: memref<64x1xi32, #tpu.memory_space<vmem>>, %arg3: memref<64x128xi32, #tpu.memory_space<vmem>>, %arg4: memref<64x128xi8, #tpu.memory_space<vmem>>) attributes {dimension_semantics = [#tpu.dimension_semantics<parallel>], iteration_bounds = array<i64: 2>, scalar_prefetch = 0 : i64, scratch_operands = 0 : i64, tpu.core_type = #tpu.core_type<tc>, window_params = [{transform_indices = @transform_0, window_bounds = array<i64: 64, 128>}, {transform_indices = @transform_1, window_bounds = array<i64: 64, 1>}, {transform_indices = @transform_2, window_bounds = array<i64: 64, 128>}, {transform_indices = @transform_3, window_bounds = array<i64: 64, 128>}]} {
    %c0 = arith.constant 0 : index
    %c0_0 = arith.constant 0 : index
    %0 = vector.load %arg1[%c0, %c0_0] : memref<64x128xi32, #tpu.memory_space<vmem>>, vector<64x128xi32>
    %c0_1 = arith.constant 0 : index
    %c0_2 = arith.constant 0 : index
    %1 = vector.load %arg2[%c0_1, %c0_2] : memref<64x1xi32, #tpu.memory_space<vmem>>, vector<64x1xi32>
    %2 = tpu.iota {dimensions = array<i32: 1>} : vector<64x128xi32>
    %c0_i32 = arith.constant 0 : i32
    %c126_i32 = arith.constant 126 : i32
    %3 = vector.broadcast %c0_i32 : i32 to vector<64x1xi32>
    %4 = arith.maxsi %3, %1 : vector<64x1xi32>
    %5 = vector.broadcast %c126_i32 : i32 to vector<64x1xi32>
    %6 = arith.minsi %5, %4 : vector<64x1xi32>
    %c1_i32 = arith.constant 1 : i32
    %7 = tpu.dynamic_rotate %0 by %c1_i32 dim 1 : vector<64x128xi32>, i32 -> vector<64x128xi32>
    %8 = vector.broadcast %6 : vector<64x1xi32> to vector<64x128xi32>
    %9 = arith.cmpi sle, %2, %8 : vector<64x128xi32>
    %c1_i32_3 = arith.constant 1 : i32
    %10 = vector.broadcast %c1_i32_3 : i32 to vector<64x1xi32>
    %11 = arith.addi %6, %10 : vector<64x1xi32>
    %12 = vector.broadcast %11 : vector<64x1xi32> to vector<64x128xi32>
    %13 = arith.cmpi eq, %2, %12 : vector<64x128xi32>
    %c0_i32_4 = arith.constant 0 : i32
    %14 = vector.broadcast %c0_i32_4 : i32 to vector<64x128xi32>
    %15 = arith.cmpi eq, %2, %14 : vector<64x128xi32>
    %c2_i32 = arith.constant 2 : i32
    %c1_i32_5 = arith.constant 1 : i32
    %16 = vector.broadcast %c2_i32 : i32 to vector<64x128xi32>
    %17 = vector.broadcast %c1_i32_5 : i32 to vector<64x128xi32>
    %18 = arith.select %13, %16, %17 : vector<64x128xi1>, vector<64x128xi32>
    %19 = arith.select %9, %7, %18 : vector<64x128xi1>, vector<64x128xi32>
    %c0_i32_6 = arith.constant 0 : i32
    %20 = vector.broadcast %c0_i32_6 : i32 to vector<64x128xi32>
    %21 = arith.select %15, %20, %19 : vector<64x128xi1>, vector<64x128xi32>
    %c0_7 = arith.constant 0 : index
    %c0_8 = arith.constant 0 : index
    %22 = vector.load %arg3[%c0_7, %c0_8] : memref<64x128xi32, #tpu.memory_space<vmem>>, vector<64x128xi32>
    tpu.vector_store %arg3[%c0_7, %c0_8], %21 {strides = array<i32>} : memref<64x128xi32, #tpu.memory_space<vmem>>, vector<64x128xi32>,
    %23 = arith.ori %9, %13 : vector<64x128xi1>
    %24 = arith.extui %23 : vector<64x128xi1> to vector<64x128xi8>
    %c0_9 = arith.constant 0 : index
    %c0_10 = arith.constant 0 : index
    %25 = vector.load %arg4[%c0_9, %c0_10] : memref<64x128xi8, #tpu.memory_space<vmem>>, vector<64x128xi8>
    tpu.vector_store %arg4[%c0_9, %c0_10], %24 {strides = array<i32>} : memref<64x128xi8, #tpu.memory_space<vmem>>, vector<64x128xi8>,
    return
  }
  func.func @transform_0(%arg0: i32) -> (i32, i32) {
    %c0_i32 = arith.constant 0 : i32
    %c0_i32_0 = arith.constant 0 : i32
    return %arg0, %c0_i32 : i32, i32
  }
  func.func @transform_1(%arg0: i32) -> (i32, i32) {
    %c0_i32 = arith.constant 0 : i32
    %c0_i32_0 = arith.constant 0 : i32
    return %arg0, %c0_i32 : i32, i32
  }
  func.func @transform_2(%arg0: i32) -> (i32, i32) {
    %c0_i32 = arith.constant 0 : i32
    %c0_i32_0 = arith.constant 0 : i32
    return %arg0, %c0_i32 : i32, i32
  }
  func.func @transform_3(%arg0: i32) -> (i32, i32) {
    %c0_i32 = arith.constant 0 : i32
    %c0_i32_0 = arith.constant 0 : i32
    return %arg0, %c0_i32 : i32, i32
  }
}

</mosaic_0001>

<bundles_post_ra>
// kernel: tpu_custom_call.1
= control target key start
LH: loop header
LB: loop body
LE: loop exit
PB: predicated region body
PF: predicated region fallthrough
CT: control target
= control target key end

     0   :  { %9 = vsyncpa [#allocation3], 0  ;;  %s1136_s0 = inlined_call_operand.vmem [shape: s32[96,128], index: 0, kind: input, shape index: {}]   ;;  %s1137_s1 = inlined_call_operand.vmem [shape: s32[96,1], index: 1, kind: input, shape index: {}]   ;;  %s1138_s2 = inlined_call_operand.hbm [shape: s32[96,128], index: 2, kind: output, shape index: {0}]   ;;  %s1139_s3 = inlined_call_operand.hbm [shape: s8[96,128], index: 3, kind: output, shape index: {1}]  }
   0x1   :  { %11 = vsyncpa [#allocation3 + $0x1], 0 }
   0x2   :  { %12 = vsyncpa [#allocation5], 0 }
   0x3   :  { %14 = vsyncpa [#allocation5 + $0x1], 0  ;;  %s802_s12 = smov 0   ;;  %s804_s13 = smov 0  }
   0x4   :  { %s806_s14 = smov 0   ;;  %s808_s15 = smov 0  }
   0x5 LB: > { %s823_s16 = sadd.s32 4294967295, %s771_s15   ;;  %s598_s17 = sadd.s32 4294967294, %s771_s15   ;;  %s771_s15 = sphi %s808_s15, %s1153_s15   ;;  %s767_s14 = sphi %s806_s14, %s1152_s14   ;;  %s763_s13 = sphi %s804_s13, %s1151_s13   ;;  %s759_s12 = sphi %s802_s12, %s1150_s12  }
   0x6   : > { %s827_s18 = sadd.s32 1, %s771_s15   ;;  %s79_s19 = sadd.s32 1, %s767_s14 }
   0x7   : > { %s76_s20 = ssub.s32 %s771_s15, %s827_s18  ;;  %p89_p0 = scmp.ne.s32.totalorder %s767_s14, %s763_s13 }
   0x8   : > { %p77_p1 = scmp.eq.s32.totalorder %s76_s20, 0  ;;  %p90_p2 = scmp.eq.s32.totalorder %s823_s16, 1 }
   0x9   : > { %p95_p3 = scmp.ne.s32.totalorder %s763_s13, %s759_s12  ;;  %p96_p4 = scmp.eq.s32.totalorder %s598_s17, 1 }
   0xa   : > { %s838_s21 = scalar_select %p77_p1, %s767_s14, %s79_s19  }
   0xb   : > { %p840_p5 = por %p90_p2, %p89_p0  ;;  %p844_p6 = por %p96_p4, %p95_p3 }
   0xc   : > { %p601_p7 = scmp.ge.s32.totalorder %s771_s15, 1  ;;  %p174_p8 = scmp.lt.s32.totalorder %s771_s15, 3 }
   0xe   : > { %p175_p9 = pnand %p601_p7, %p174_p8 }
   0xf   : > { %s851_s24 = sshll.u32 (!%p175_p9), %s823_s16, 3  ;;  %v773_v0 = vmov (!%p175_p9), 0   ;;  %s774_s6 = smov (!%p175_p9), 1   ;;  %v272_v51 = vlaneseq (!%p175_p9)  ;;  %v775_v57 = vmov (!%p175_p9), 1  }
  0x10   : > { %178 = sbr.rel (%p175_p9) target bundleno = 266 (0x10a), region = 28  ;;  %p221_p10 = scmp.lt.s32.totalorder (!%p175_p9), %s851_s24, 11  ;;  %675 = vset.pattern.permute.xlu1 (!%p175_p9), %v773_v0  ;;  %676 = vset.pattern.permute.xlu0 (!%p175_p9), %v773_v0 }
  0x11   : > { %s886_s7 = sand.u32 (!%p175_p9), 1, %s763_s13   ;;  %v898_v54 = vand.u32 (!%p175_p9), 127, %v272_v51 }
  0x12   : > { %s602_s8 = sshll.u32 (!%p175_p9), %s886_s7, 6  ;;  %s603_s10 = sshll.u32 (!%p175_p9), %s886_s7, 4 }
  0x13   : > { %s914_s9 = scalar_lea.vmem (!%p175_p9), [#allocation2], %s602_s8  ;;  %s978_s11 = scalar_lea.vmem (!%p175_p9), [#allocation4], %s603_s10 }
  0x14   : > { %s446_s17 = scalar_lea.sflag (!%p175_p9), [#allocation3], %s886_s7  ;;  %s451_s19 = scalar_lea.sflag (!%p175_p9), [#allocation5], %s886_s7 }
  0x17   : > { %s222_s25 = scalar_select %p221_p10, %s851_s24, 11 }
  0x18   : > { %s459_s20 = ssub.s32 (%p840_p5), 12, %s851_s24 }
  0x19   : > { %s605_s26 = sshll.u32 %s222_s25, 3  ;;  %p460_p11 = scmp.lt.s32.totalorder (%p840_p5), %s459_s20, 8 }
  0x1a   : > { %s860_s29 = scalar_lea.vmem %s1136_s0, %s605_s26  ;;  %s865_s5 = scalar_lea.vmem %s1137_s1, %s605_s26 }
  0x1b   : > { %v258_v1 = vld [vmem:[%s860_s29 + $0x10] sm:$0xff]  ;;  %v256_v2 = vld [vmem:[%s860_s29] sm:$0xff]  ;;  %v259_v3 = vld [vmem:[%s860_s29 + $0x18] sm:$0xff] }
  0x1c   : > { %310 = vrot.lane.b32.xlu1 %v258_v1, %s774_s6  ;;  %306 = vrot.lane.b32.xlu0 %v256_v2, %s774_s6  ;;  %v264_v4 = vld [vmem:[%s865_s5] sm:$0xff]  ;;  %v257_v5 = vld [vmem:[%s860_s29 + $0x8] sm:$0xff] }
  0x1d   : > { %vm274_vm0 = vcmp.gt.s32.totalorder %v264_v4, 0  ;;  %v266_v6 = vld [vmem:[%s865_s5 + $0x10] sm:$0xff]  ;;  %v265_v7 = vld [vmem:[%s865_s5 + $0x8] sm:$0xff]  ;;  %v267_v9 = vld [vmem:[%s865_s5 + $0x18] sm:$0xff] }
  0x1e   : > { %v275_v8 = vsel %vm274_vm0, %v264_v4, 0  ;;  %vm278_vm1 = vcmp.gt.s32.totalorder %v266_v6, 0  ;;  %vm276_vm2 = vcmp.gt.s32.totalorder %v265_v7, 0  ;;  %v268_v12 = vld [vmem:[%s865_s5 + $0x20] sm:$0xff]  ;;  %vm280_vm4 = vcmp.gt.s32.totalorder %v267_v9, 0  ;;  %v269_v15 = vld [vmem:[%s865_s5 + $0x28] sm:$0xff] }
  0x1f   : > { %vm290_vm3 = vcmp.lt.s32.totalorder %v275_v8, 126  ;;  %v279_v10 = vsel %vm278_vm1, %v266_v6, 0  ;;  %v277_v11 = vsel %vm276_vm2, %v265_v7, 0  ;;  %v260_v14 = vld [vmem:[%s860_s29 + $0x20] sm:$0xff]  ;;  %v270_v16 = vld [vmem:[%s865_s5 + $0x30] sm:$0xff]  ;;  %vm282_vm7 = vcmp.gt.s32.totalorder %v268_v12, 0 }
  0x20   : > { %312 = vrot.lane.b32.xlu1 %v259_v3, %s774_s6  ;;  %308 = vrot.lane.b32.xlu0 %v257_v5, %s774_s6  ;;  %v291_v13 = vsel %vm290_vm3, %v275_v8, 126  ;;  %vm294_vm5 = vcmp.lt.s32.totalorder %v279_v10, 126  ;;  %vm292_vm6 = vcmp.lt.s32.totalorder %v277_v11, 126  ;;  %v281_v17 = vsel %vm280_vm4, %v267_v9, 0  ;;  %v271_v21 = vld [vmem:[%s865_s5 + $0x38] sm:$0xff]  ;;  %v261_v38 = vld [vmem:[%s860_s29 + $0x28] sm:$0xff] }
  0x21   : > { %v283_v18 = vsel %vm282_vm7, %v268_v12, 0  ;;  %vm284_vm8 = vcmp.gt.s32.totalorder %v269_v15, 0  ;;  %vm286_vm9 = vcmp.gt.s32.totalorder %v270_v16, 0  ;;  %v295_v19 = vsel %vm294_vm5, %v279_v10, 126  ;;  %v262_v39 = vld [vmem:[%s860_s29 + $0x30] sm:$0xff]  ;;  %v263_v40 = vld [vmem:[%s860_s29 + $0x38] sm:$0xff] }
  0x22   : > { %v293_v20 = vsel %vm292_vm6, %v277_v11, 126  ;;  %vm296_vm10 = vcmp.lt.s32.totalorder %v281_v17, 126  ;;  %vm298_vm11 = vcmp.lt.s32.totalorder %v283_v18, 126  ;;  %v285_v22 = vsel %vm284_vm8, %v269_v15, 0 }
  0x23   : > { %v287_v23 = vsel %vm286_vm9, %v270_v16, 0  ;;  %vm288_vm12 = vcmp.gt.s32.totalorder %v271_v21, 0  ;;  %v297_v24 = vsel %vm296_vm10, %v281_v17, 126  ;;  %v299_v25 = vsel %vm298_vm11, %v283_v18, 126 }
  0x24   : > { %323 = vperm.xlu1 %675, %v291_v13   ;;  %314 = vrot.lane.b32.xlu0 %v260_v14, %s774_s6  ;;  %vm300_vm13 = vcmp.lt.s32.totalorder %v285_v22, 126  ;;  %vm302_vm14 = vcmp.lt.s32.totalorder %v287_v23, 126  ;;  %v289_v26 = vsel %vm288_vm12, %v271_v21, 0  ;;  %v354_v29 = vadd.s32 1, %v291_v13 }
  0x25   : > { %v301_v27 = vsel %vm300_vm13, %v285_v22, 126  ;;  %v303_v28 = vsel %vm302_vm14, %v287_v23, 126  ;;  %vm304_vm15 = vcmp.lt.s32.totalorder %v289_v26, 126  ;;  %v356_v31 = vadd.s32 1, %v295_v19 }
  0x26   : > { %v305_v30 = vsel %vm304_vm15, %v289_v26, 126  ;;  %v355_v32 = vadd.s32 1, %v293_v20  ;;  %v357_v33 = vadd.s32 1, %v297_v24  ;;  %v358_v34 = vadd.s32 1, %v299_v25 }
  0x27   : > { %v359_v35 = vadd.s32 1, %v301_v27  ;;  %v360_v36 = vadd.s32 1, %v303_v28  ;;  %v361_v37 = vadd.s32 1, %v305_v30  ;;  %vm394_vm0 = vcmp.eq.s32.totalorder %v898_v54, 0 }
  0x28   : > { %329 = vperm.xlu1 %675, %v295_v19   ;;  %326 = vperm.xlu0 %676, %v293_v20  }
  0x2c   : > { %332 = vperm.xlu1 %675, %v297_v24   ;;  %335 = vperm.xlu0 %676, %v299_v25  }
  0x30   : > { %338 = vperm.xlu1 %675, %v301_v27   ;;  %341 = vperm.xlu0 %676, %v303_v28  }
  0x34   : > { %344 = vperm.xlu1 %675, %v305_v30   ;;  %363 = vperm.xlu0 %676, %v354_v29  }
  0x38   : > { %366 = vperm.xlu1 %675, %v355_v32   ;;  %369 = vperm.xlu0 %676, %v356_v31  }
  0x3c   : > { %372 = vperm.xlu1 %675, %v357_v33   ;;  %375 = vperm.xlu0 %676, %v358_v34  }
  0x40   : > { %378 = vperm.xlu1 %675, %v359_v35   ;;  %381 = vperm.xlu0 %676, %v360_v36  }
  0x44   : > { %384 = vperm.xlu1 %675, %v361_v37   ;;  %316 = vrot.lane.b32.xlu0 %v261_v38, %s774_s6 }
  0x48   : > { %318 = vrot.lane.b32.xlu1 %v262_v39, %s774_s6  ;;  %320 = vrot.lane.b32.xlu0 %v263_v40, %s774_s6 }
  0x8e   : > { %v307_v41 = vpop.permute.xlu0 %306  ;;  %v311_v42 = vpop.permute.xlu1 %310 }
  0x92   : > { %v309_v43 = vpop.permute.xlu0 %308  ;;  %v313_v44 = vpop.permute.xlu1 %312 }
  0x96   : > { %v315_v45 = vpop.permute.xlu0 %314 }
  0xa3   : > { %v324_v46 = vpop.permute.xlu1 %323 }
  0xa4   : > { %vm346_vm2 = vcmp.le.s32.totalorder %v898_v54, %v324_v46 }
  0xa7   : > { %v330_v47 = vpop.permute.xlu1 %329  ;;  %v327_v48 = vpop.permute.xlu0 %326 }
  0xa8   : > { %vm347_vm3 = vcmp.le.s32.totalorder %v898_v54, %v327_v48  ;;  %vm348_vm6 = vcmp.le.s32.totalorder %v898_v54, %v330_v47 }
  0xab   : > { %v333_v49 = vpop.permute.xlu1 %332  ;;  %v336_v50 = vpop.permute.xlu0 %335 }
  0xac   : > { %vm349_vm10 = vcmp.le.s32.totalorder %v898_v54, %v333_v49  ;;  %vm350_vm14 = vcmp.le.s32.totalorder %v898_v54, %v336_v50 }
  0xaf   : > { %v894_v52 = vpop.permute.xlu1 %338  ;;  %v896_v53 = vpop.permute.xlu0 %341 }
  0xb3   : > { %v901_v55 = vpop.permute.xlu1 %344  ;;  %v364_v56 = vpop.permute.xlu0 %363 }
  0xb4   : > { %vm386_vm1 = vcmp.eq.s32.totalorder %v898_v54, %v364_v56 }
  0xb5   : > { %v395_v58 = vsel %vm386_vm1, 2, %v775_v57  ;;  %vm932_vm8 = vmor %vm346_vm2, %vm386_vm1 }
  0xb6   : > { %v403_v59 = vsel %vm346_vm2, %v307_v41, %v395_v58 }
  0xb7   : > { %v411_v60 = vsel %vm394_vm0, 0, %v403_v59  ;;  %v367_v61 = vpop.permute.xlu1 %366  ;;  %v370_v62 = vpop.permute.xlu0 %369 }
  0xb8   : > { %419 = vst [vmem:[%s914_s9] sm:$0xff] %v411_v60  ;;  %vm387_vm4 = vcmp.eq.s32.totalorder %v898_v54, %v367_v61  ;;  %vm388_vm5 = vcmp.eq.s32.totalorder %v898_v54, %v370_v62 }
  0xb9   : > { %v396_v63 = vsel %vm387_vm4, 2, %v775_v57  ;;  %vm921_vm7 = vmor %vm347_vm3, %vm387_vm4  ;;  %v397_v2 = vsel %vm388_vm5, 2, %v775_v57 }
  0xba   : > { %v404_v4 = vsel %vm347_vm3, %v309_v43, %v396_v63  ;;  %v405_v5 = vsel %vm348_vm6, %v311_v42, %v397_v2  ;;  %vm435_vm9 = vmpackc.low %vm921_vm7, %vm932_vm8  ;;  %vm351_vm3 = vcmp.le.s32.totalorder %v898_v54, %v894_v52  ;;  %vm352_vm8 = vcmp.le.s32.totalorder %v898_v54, %v896_v53 }
  0xbb   : > { %v412_v6 = vsel %vm394_vm0, 0, %v404_v4  ;;  %v413_v7 = vsel %vm394_vm0, 0, %v405_v5  ;;  %v373_v8 = vpop.permute.xlu1 %372  ;;  %v376_v9 = vpop.permute.xlu0 %375  ;;  %vm429_vm11 = vmor %vm348_vm6, %vm388_vm5 }
  0xbc   : > { %420 = vst [vmem:[%s914_s9 + $0x8] sm:$0xff] %v412_v6  ;;  %421 = vst [vmem:[%s914_s9 + $0x10] sm:$0xff] %v413_v7  ;;  %vm389_vm12 = vcmp.eq.s32.totalorder %v898_v54, %v373_v8  ;;  %vm390_vm13 = vcmp.eq.s32.totalorder %v898_v54, %v376_v9 }
  0xbd   : > { %v398_v10 = vsel %vm389_vm12, 2, %v775_v57  ;;  %vm430_vm15 = vmor %vm349_vm10, %vm389_vm12  ;;  %v399_v11 = vsel %vm390_vm13, 2, %v775_v57 }
  0xbe   : > { %v406_v12 = vsel %vm349_vm10, %v313_v44, %v398_v10  ;;  %vm436_vm1 = vmpackc.low %vm430_vm15, %vm429_vm11  ;;  %v407_v13 = vsel %vm350_vm14, %v315_v45, %v399_v11  ;;  %vm353_vm10 = vcmp.le.s32.totalorder %v898_v54, %v901_v55 }
  0xbf   : > { %v414_v14 = vsel %vm394_vm0, 0, %v406_v12  ;;  %vm437_vm2 = vmpackc.even %vm436_vm1, %vm435_vm9  ;;  %v415_v15 = vsel %vm394_vm0, 0, %v407_v13  ;;  %v379_v16 = vpop.permute.xlu1 %378  ;;  %v382_v17 = vpop.permute.xlu0 %381 }
  0xc0   : > { %422 = vst [vmem:[%s914_s9 + $0x18] sm:$0xff] %v414_v14  ;;  %v441_v18 = vsel %vm437_vm2, 16843009, %v773_v0  ;;  %423 = vst [vmem:[%s914_s9 + $0x20] sm:$0xff] %v415_v15  ;;  %vm391_vm4 = vcmp.eq.s32.totalorder %v898_v54, %v379_v16  ;;  %vm392_vm6 = vcmp.eq.s32.totalorder %v898_v54, %v382_v17 }
  0xc1   : > { %443 = vst [vmem:[%s978_s11] sm:$0xff] %v441_v18  ;;  %vm984_vm5 = vmor %vm351_vm3, %vm391_vm4  ;;  %v400_v21 = vsel %vm391_vm4, 2, %v775_v57  ;;  %v401_v26 = vsel %vm392_vm6, 2, %v775_v57 }
  0xc2   : > { %vm993_vm7 = vmor %vm350_vm14, %vm390_vm13 }
  0xc3   : > { %vm438_vm9 = vmpackc.low %vm984_vm5, %vm993_vm7  ;;  %v385_v22 = vpop.permute.xlu1 %384  ;;  %v317_v23 = vpop.permute.xlu0 %316 }
  0xc4   : > { %vm433_vm11 = vmor %vm352_vm8, %vm392_vm6  ;;  %vm393_vm12 = vcmp.eq.s32.totalorder %v898_v54, %v385_v22  ;;  %v408_v24 = vsel %vm351_vm3, %v317_v23, %v400_v21  ;;  %457 = sbr.rel (!%p840_p5) target bundleno = 231 (0xe7), region = 32 }
  0xc5   : > { %vm434_vm13 = vmor %vm353_vm10, %vm393_vm12  ;;  %v416_v25 = vsel %vm394_vm0, 0, %v408_v24  ;;  %v402_v27 = vsel %vm393_vm12, 2, %v775_v57 }
  0xc6   : > { %vm439_vm14 = vmpackc.low %vm434_vm13, %vm433_vm11  ;;  %424 = vst [vmem:[%s914_s9 + $0x28] sm:$0xff] %v416_v25 }
  0xc7   : > { %vm440_vm15 = vmpackc.even %vm439_vm14, %vm438_vm9  ;;  %v319_v28 = vpop.permute.xlu1 %318  ;;  %v321_v29 = vpop.permute.xlu0 %320 }
  0xc8   : > { %v442_v30 = vsel %vm440_vm15, 16843009, %v773_v0  ;;  %v409_v31 = vsel %vm352_vm8, %v319_v28, %v401_v26  ;;  %v410_v32 = vsel %vm353_vm10, %v321_v29, %v402_v27 }
  0xc9   : > { %444 = vst [vmem:[%s978_s11 + $0x8] sm:$0xff] %v442_v30  ;;  %v417_v33 = vsel %vm394_vm0, 0, %v409_v31  ;;  %v418_v34 = vsel %vm394_vm0, 0, %v410_v32 }
  0xca   : > { %425 = vst [vmem:[%s914_s9 + $0x30] sm:$0xff] %v417_v33  ;;  %426 = vst [vmem:[%s914_s9 + $0x38] sm:$0xff] %v418_v34 }
  0xcb   : > { %s1155_s20 = smov (!%p460_p11, %s459_s20), 8 }
  0xcc   : > { %s1034_s25 = sshll.u32 %s1155_s20, 7 }
  0xcd   : > { %s464_s26 = ssub.s32 1024, %s1034_s25 }
  0xce   : > { %465 = vsyncadd %s446_s17, %s464_s26  ;;  %p612_p12 = scmp.ne.s32.totalorder %s1034_s25, 0  ;;  %s624_s27 = sshll.u32 %s823_s16, 10 }
  0xcf   : > { %s1044_s30 = scalar_lea.hbm %s1138_s2, %s624_s27  ;;  %s470_s24 = sshll.u32 %s914_s9, 4  ;;  %s1047_s24 = int_to_ptr.vmem [resolvable:$true] %s470_s24 }
  0xd0   : > { %s677_s4 = scalar_lea.vmem %s1047_s24, %s1034_s25  ;;  %s776_s5 = smov [#allocation2]  }
  0xd1   : > { %p678_p13 = scmp.ne.s32.totalorder %s1047_s24, %s677_s4  ;;  %s681_s6 = sshll.u32 %s776_s5, 4  ;;  %s682_s6 = int_to_ptr.vmem [resolvable:$false] %s681_s6 }
  0xd2   : > { %s683_s8 = scalar_lea.vmem %s682_s6, 2048  ;;  %p684_p2 = scmp.lt.s32.totalorder %s1047_s24, %s682_s6 }
  0xd3   : > { %p679_p0 = pnand %p678_p13, %p612_p12  ;;  %p685_p3 = scmp.lt.s32.totalorder %s683_s8, %s677_s4 }
  0xd5   : > { %p680_p1 = pneg %p679_p0  ;;  %p686_p4 = por %p685_p3, %p684_p2 }
  0xd7   : > { %p687_p7 = pnand %p686_p4, %p680_p1 }
  0xd9   : > { %690 = shalt.err (!%p687_p7)
}
  0xda   : > { %s691_s9 = scalar_lea.hbm %s1044_s30, %s1034_s25  ;;  %s695_s26 = scalar_lea.hbm %s1138_s2, 1536 }
  0xdb   : > { %p692_p8 = scmp.ne.s32.totalorder %s1044_s30, %s691_s9  ;;  %p696_p11 = scmp.lt.u32.totalorder %s1044_s30, %s1138_s2 }
  0xdc   : > { %p697_p13 = scmp.lt.u32.totalorder %s695_s26, %s691_s9  ;;  %p699_p1 = scmp.lt.u32.totalorder %s691_s9, %s1044_s30 }
  0xdd   : > { %p693_p9 = pnand %p692_p8, %p612_p12 }
  0xde   : > { %p698_p0 = por %p697_p13, %p696_p11 }
  0xdf   : > { %p694_p10 = pneg %p693_p9 }
  0xe0   : > { %p700_p2 = por %p699_p1, %p698_p0 }
  0xe2   : > { %p701_p3 = pnand %p700_p2, %p694_p10 }
  0xe4   : > { %704 = shalt.err (!%p701_p3)
}
  0xe5   : > { %s777_s29 = smov 128   ;;  %s778_s4 = smov 8  }
  0xe6   : > { %476 = dma.vmem_to_hbm [thread:$0]  (%p612_p12), %s1047_s24, %s1034_s25, %s1044_s30, %s446_s17, %s777_s29, %s777_s29, %s778_s4  }
  0xe7 PF: > { %479 = sbr.rel (!%p840_p5) target bundleno = 266 (0x10a), region = 36  ;;  %s616_s5 = sshll.u32 (%p840_p5), %s823_s16, 1 }
  0xe8   : > { %s481_s6 = ssub.s32 (%p840_p5), 3, %s616_s5 }
  0xe9   : > { %p482_p4 = scmp.lt.s32.totalorder (%p840_p5), %s481_s6, 2 }
  0xee   : > { %s1157_s6 = smov (!%p482_p4, %s481_s6), 2 }
  0xef   : > { %s1078_s8 = sshll.u32 %s1157_s6, 7 }
  0xf0   : > { %s486_s9 = ssub.s32 256, %s1078_s8 }
  0xf1   : > { %487 = vsyncadd %s451_s19, %s486_s9  ;;  %p618_p12 = scmp.ne.s32.totalorder %s1078_s8, 0  ;;  %s625_s22 = sshll.u32 %s823_s16, 8 }
  0xf2   : > { %s1088_s30 = scalar_lea.hbm %s1139_s3, %s625_s22  ;;  %s492_s24 = sshll.u32 %s978_s11, 4  ;;  %s1091_s24 = int_to_ptr.vmem [resolvable:$true] %s492_s24 }
  0xf3   : > { %s705_s10 = scalar_lea.vmem %s1091_s24, %s1078_s8  ;;  %s779_s20 = smov [#allocation4]  }
  0xf4   : > { %p706_p5 = scmp.ne.s32.totalorder %s1091_s24, %s705_s10  ;;  %s709_s26 = sshll.u32 %s779_s20, 4  ;;  %s710_s26 = int_to_ptr.vmem [resolvable:$false] %s709_s26 }
  0xf5   : > { %s711_s16 = scalar_lea.vmem %s710_s26, 512  ;;  %p712_p9 = scmp.lt.s32.totalorder %s1091_s24, %s710_s26 }
  0xf6   : > { %p707_p7 = pnand %p706_p5, %p618_p12  ;;  %p713_p10 = scmp.lt.s32.totalorder %s711_s16, %s705_s10 }
  0xf8   : > { %p708_p8 = pneg %p707_p7  ;;  %p714_p11 = por %p713_p10, %p712_p9 }
  0xfa   : > { %p715_p13 = pnand %p714_p11, %p708_p8 }
  0xfc   : > { %718 = shalt.err (!%p715_p13)
}
  0xfd   : > { %s719_s11 = scalar_lea.hbm %s1088_s30, %s1078_s8  ;;  %s723_s29 = scalar_lea.hbm %s1139_s3, 384 }
  0xfe   : > { %p720_p0 = scmp.ne.s32.totalorder %s1088_s30, %s719_s11  ;;  %p724_p3 = scmp.lt.u32.totalorder %s1088_s30, %s1139_s3 }
  0xff   : > { %p725_p4 = scmp.lt.u32.totalorder %s723_s29, %s719_s11  ;;  %p727_p7 = scmp.lt.u32.totalorder %s719_s11, %s1088_s30 }
 0x100   : > { %p721_p1 = pnand %p720_p0, %p618_p12 }
 0x101   : > { %p726_p5 = por %p725_p4, %p724_p3 }
 0x102   : > { %p722_p2 = pneg %p721_p1 }
 0x103   : > { %p728_p8 = por %p727_p7, %p726_p5 }
 0x105   : > { %p729_p9 = pnand %p728_p8, %p722_p2 }
 0x107   : > { %732 = shalt.err (!%p729_p9)
}
 0x108   : > { %s780_s6 = smov 128   ;;  %s781_s9 = smov 8  }
 0x109   : > { %498 = dma.vmem_to_hbm [thread:$0]  (%p618_p12), %s1091_s24, %s1078_s8, %s1088_s30, %s451_s19, %s780_s6, %s780_s6, %s781_s9  }
 0x10a PF: > { %p635_p10 = scmp.ge.s32.totalorder %s771_s15, 2  ;;  %s507_s22 = sand.u32 1, %s759_s12  }
 0x10b   : > { %s508_s17 = scalar_lea.sflag [#allocation3], %s507_s22 }
 0x10c   : > { %p629_p11 = pnand %p635_p10, %p844_p6 }
 0x10e   : > { %750 = dma.done.wait (!%p629_p11), %s508_s17, 1024  }
 0x10f   : > { %752 = vsyncadd (!%p629_p11), %s508_s17, 4294966272  ;;  %s517_s25 = scalar_lea.sflag [#allocation5], %s507_s22 }
 0x110   : > { %754 = dma.done.wait (!%p629_p11), %s517_s25, 256  }
 0x111   : > { %756 = vsyncadd (!%p629_p11), %s517_s25, 4294967040  ;;  %p17_p12 = scmp.ge.s32.totalorder %s827_s18, 4   ;;  %s1150_s12 = smov %s763_s13 }
 0x112   : > { %s1151_s13 = smov %s767_s14  ;;  %s1152_s14 = smov %s838_s21 }
 0x113   : > { %s1153_s15 = smov %s827_s18  ;;  %19 = sbr.rel (!%p17_p12) target bundleno = 5 (0x5), region = 83 }
 0x11a   :  { %522 = vsyncpa [#allocation3], 1 }
 0x11b   :  { %524 = vsyncpa [#allocation3 + $0x1], 1 }
 0x11c   :  { %525 = vsyncpa [#allocation5], 1 }
 0x11d   :  { %527 = vsyncpa [#allocation5 + $0x1], 1 }

</bundles_post_ra>
